<compile_context>
chip_gen: v5e
topology: v5e:2x2
jax: 0.10.0
libtpu: 0.0.40
codegen_flags: <defaults>
</compile_context>

<pallas_src>
import jax
import jax.numpy as jnp
from jax.experimental import pallas as pl
from jax.experimental.pallas import tpu as pltpu


# ---------------------------------------------------------------------------
# Path 1 (default): direct HBM->HBM chunked DMA copy, no VMEM staging.
# ---------------------------------------------------------------------------
def _make_dma_copy_kernel(chunks, per_prog_rows):
    """chunks: static tuple of (row_offset, row_count) inside one program's
    row range; per_prog_rows: static number of rows each grid program owns."""

    def kernel(x_hbm, o_hbm, sems):
        base = pl.program_id(0) * per_prog_rows
        copies = []
        # Start all chunked DMAs first so several are in flight, then wait.
        for i, (off, size) in enumerate(chunks):
            cp = pltpu.make_async_copy(
                x_hbm.at[pl.ds(base + off, size)],
                o_hbm.at[pl.ds(base + off, size)],
                sems.at[i],
            )
            cp.start()
            copies.append(cp)
        for cp in copies:
            cp.wait()

    return kernel


def _dma_slab(B, F):
    """2D (rows, lanes) factorisation with enough rows to chunk the copy.
    DMA chunks are contiguous HBM regions either way; this just gives the
    chunking some granularity even when B is tiny."""
    n = B * F
    for lanes in (4096, 2048, 1024, 512, 256, 128):
        if n % lanes == 0 and n // lanes >= 8:
            return n // lanes, lanes
    return B, F


def _materialize_dma(x_flat):
    B, F = x_flat.shape
    rows, lanes = _dma_slab(B, F)
    x_slab = x_flat.reshape(rows, lanes)          # metadata-only

    # v7x: two TensorCores each drive their own DMA stream; v5e/v6e: a cheap
    # 2-step serial loop.
    num_programs = 2 if (rows % 2 == 0 and rows >= 2) else 1
    per_prog = rows // num_programs

    # Up to 4 DMAs in flight per program.
    n_chunks = max(1, min(4, per_prog))
    base_sz, rem = divmod(per_prog, n_chunks)
    chunks, off = [], 0
    for i in range(n_chunks):
        sz = base_sz + (1 if i < rem else 0)
        chunks.append((off, sz))
        off += sz
    chunks = tuple(chunks)

    out = pl.pallas_call(
        _make_dma_copy_kernel(chunks, per_prog),
        out_shape=jax.ShapeDtypeStruct((rows, lanes), x_flat.dtype),
        grid_spec=pltpu.PrefetchScalarGridSpec(
            num_scalar_prefetch=0,
            grid=(num_programs,),
            in_specs=[pl.BlockSpec(memory_space=pl.ANY)],
            out_specs=pl.BlockSpec(memory_space=pl.ANY),
            scratch_shapes=[pltpu.SemaphoreType.DMA((n_chunks,))],
        ),
        compiler_params=pltpu.CompilerParams(
            dimension_semantics=("parallel",),
        ),
    )(x_slab)
    return out.reshape(B, F)                      # metadata-only un-slab


# ---------------------------------------------------------------------------
# Path 2 (fallback): BlockSpec-pipelined VMEM slab copy.
# ---------------------------------------------------------------------------
def _copy_slab_kernel(x_ref, o_ref):
    # Pure copy of a lane-dense, fully tile-aligned (rb, lanes) block.
    o_ref[...] = x_ref[...]


def _sublane_multiple(itemsize):
    # Native packed sublane tile: 8 rows f32, 16 rows bf16, 32 rows int8/fp8.
    return max(8, 32 // itemsize)


def _choose_slab(n, sub):
    for lanes in (4096, 2048, 1024, 512, 256, 128):
        if n % lanes:
            continue
        rows = n // lanes
        if rows % sub == 0:
            return rows, lanes
    return None


def _cap_bytes_for_device():
    # Generation-aware block cap: 4 buffers (in+out, double-buffered) x cap
    # must stay inside scoped VMEM; v7x's faster HBM wants bigger blocks to
    # amortize the ~0.35 us per-step overhead.
    try:
        kind = jax.devices()[0].device_kind.lower()
    except Exception:
        kind = ""
    if "v5" in kind:
        return 2 << 20
    if "v7" in kind:
        return 6 << 20
    return 4 << 20                                # v6e and unknown chips


def _choose_row_block(rows, lanes, itemsize, sub, cap_bytes):
    # rows is guaranteed to be a multiple of `sub` by the caller.
    max_rb = max(sub, (cap_bytes // (lanes * itemsize)) // sub * sub)
    rb = min(rows, max_rb)
    while rows % rb != 0:
        rb -= sub
    # Prefer a grid of >= 2 so v7x's two TensorCores both get work.
    if rows // rb < 2:
        half = (rows // 2) // sub * sub
        if half >= sub and rows % half == 0:
            rb = half
    return rb


def _materialize_pipelined(x_flat):
    B, F = x_flat.shape
    n = B * F
    itemsize = jnp.dtype(x_flat.dtype).itemsize
    sub = _sublane_multiple(itemsize)

    slab = _choose_slab(n, sub)
    if slab is None:
        # Not (sub,128)-tileable: route to the HBM->HBM DMA path instead of a
        # masked-tail copy or a whole-tensor VMEM block.
        return _materialize_dma(x_flat)

    rows, lanes = slab
    rb = _choose_row_block(rows, lanes, itemsize, sub, _cap_bytes_for_device())
    block_bytes = rb * lanes * itemsize
    x_slab = x_flat.reshape(rows, lanes)          # metadata-only

    out = pl.pallas_call(
        _copy_slab_kernel,
        out_shape=jax.ShapeDtypeStruct((rows, lanes), x_flat.dtype),
        grid_spec=pltpu.PrefetchScalarGridSpec(
            num_scalar_prefetch=0,
            grid=(rows // rb,),
            in_specs=[pl.BlockSpec((rb, lanes), lambda r: (r, 0))],
            out_specs=pl.BlockSpec((rb, lanes), lambda r: (r, 0)),
        ),
        compiler_params=pltpu.CompilerParams(
            dimension_semantics=("parallel",),
            # 2 operands x 2 buffers x block + headroom; safe on every
            # generation given the per-chip cap above.
            vmem_limit_bytes=4 * block_bytes + (4 << 20),
        ),
    )(x_slab)
    return out.reshape(B, F)                      # metadata-only un-slab


# ---------------------------------------------------------------------------
# Public wrapper — torch `x.view(x.size(0), -1)` equivalent.
# ---------------------------------------------------------------------------
def reshape_forward(x, materialize=True, method="dma"):
    """Flatten all trailing dims: (B, ...) -> (B, prod(...)).

    materialize=False (recommended): metadata-only reshape, zero HBM traffic.
    materialize=True : fresh HBM buffer produced by a Pallas copy kernel.
        method="dma"       direct HBM->HBM chunked DMA (default, no VMEM staging)
        method="pipelined" BlockSpec-pipelined VMEM slab copy (fallback)
    """
    B = x.shape[0]
    F = 1
    for d in x.shape[1:]:
        F *= d

    x_flat = x.reshape(B, F)                      # metadata-only row-major flatten
    if not materialize:
        return x_flat
    if method == "pipelined":
        return _materialize_pipelined(x_flat)
    return _materialize_dma(x_flat)


if __name__ == "__main__":
    key = jax.random.PRNGKey(0)
    # Small NCHW input consistent with how Reshape is used in
    # learning_loss_for_al (flattening conv feature maps).
    B, C, H, W = 2, 4, 16, 16
    x = jax.random.normal(key, (B, C, H, W), dtype=jnp.float32)
    y_ref = x.reshape(B, C * H * W)               # semantics of x.view(B, -1)

    # Default path: direct HBM->HBM chunked DMA copy.
    y = jax.block_until_ready(reshape_forward(x, materialize=True))
    assert y.shape == (B, C * H * W), y.shape
    assert y.dtype == x.dtype
    assert bool(jnp.all(y == y_ref))

    # Fallback path: BlockSpec-pipelined VMEM slab copy.
    y2 = jax.block_until_ready(
        reshape_forward(x, materialize=True, method="pipelined"))
    assert y2.shape == (B, C * H * W)
    assert bool(jnp.all(y2 == y_ref))

    # Recommended zero-copy path.
    y_view = jax.block_until_ready(reshape_forward(x, materialize=False))
    assert bool(jnp.all(y_view == y_ref))

    print("KERNEL_OK")
</pallas_src>

<mosaic_0001>
module attributes {stable_mosaic.version = 11 : i64} {
  func.func @kernel(%arg0: i32, %arg1: memref<8x256xf32, #tpu.memory_space<any>>, %arg2: memref<8x256xf32, #tpu.memory_space<any>>, %arg3: memref<4x!tpu.dma_semaphore, #tpu.memory_space<semaphore_mem>>) attributes {dimension_semantics = [#tpu.dimension_semantics<parallel>], iteration_bounds = array<i64: 2>, scalar_prefetch = 0 : i64, scratch_operands = 1 : i64, tpu.core_type = #tpu.core_type<tc>, window_params = [{}, {}]} {
    %c4_i32 = arith.constant 4 : i32
    %0 = arith.muli %arg0, %c4_i32 : i32
    %c0_i32 = arith.constant 0 : i32
    %1 = arith.addi %0, %c0_i32 : i32
    %c0_i32_0 = arith.constant 0 : i32
    %2 = arith.addi %0, %c0_i32_0 : i32
    %c0_i32_1 = arith.constant 0 : i32
    %c0_i32_2 = arith.constant 0 : i32
    %3 = tpu.memref_slice %arg1[%1, %c0_i32_2] : memref<8x256xf32, #tpu.memory_space<any>> -> memref<1x256xf32, #tpu.memory_space<any>>
    %c0_i32_3 = arith.constant 0 : i32
    %4 = tpu.memref_slice %arg2[%2, %c0_i32_3] : memref<8x256xf32, #tpu.memory_space<any>> -> memref<1x256xf32, #tpu.memory_space<any>>
    %5 = tpu.memref_slice %arg3[%c0_i32_1] : memref<4x!tpu.dma_semaphore, #tpu.memory_space<semaphore_mem>> -> memref<1x!tpu.dma_semaphore, #tpu.memory_space<semaphore_mem>>
    %6 = tpu.memref_squeeze %5 : memref<1x!tpu.dma_semaphore, #tpu.memory_space<semaphore_mem>> -> memref<!tpu.dma_semaphore, #tpu.memory_space<semaphore_mem>>
    tpu.enqueue_dma source(%3 : memref<1x256xf32, #tpu.memory_space<any>>) target(%4 : memref<1x256xf32, #tpu.memory_space<any>>) target_semaphore(%6 : memref<!tpu.dma_semaphore, #tpu.memory_space<semaphore_mem>>)
    %c1_i32 = arith.constant 1 : i32
    %7 = arith.addi %0, %c1_i32 : i32
    %c1_i32_4 = arith.constant 1 : i32
    %8 = arith.addi %0, %c1_i32_4 : i32
    %c1_i32_5 = arith.constant 1 : i32
    %c0_i32_6 = arith.constant 0 : i32
    %9 = tpu.memref_slice %arg1[%7, %c0_i32_6] : memref<8x256xf32, #tpu.memory_space<any>> -> memref<1x256xf32, #tpu.memory_space<any>>
    %c0_i32_7 = arith.constant 0 : i32
    %10 = tpu.memref_slice %arg2[%8, %c0_i32_7] : memref<8x256xf32, #tpu.memory_space<any>> -> memref<1x256xf32, #tpu.memory_space<any>>
    %11 = tpu.memref_slice %arg3[%c1_i32_5] : memref<4x!tpu.dma_semaphore, #tpu.memory_space<semaphore_mem>> -> memref<1x!tpu.dma_semaphore, #tpu.memory_space<semaphore_mem>>
    %12 = tpu.memref_squeeze %11 : memref<1x!tpu.dma_semaphore, #tpu.memory_space<semaphore_mem>> -> memref<!tpu.dma_semaphore, #tpu.memory_space<semaphore_mem>>
    tpu.enqueue_dma source(%9 : memref<1x256xf32, #tpu.memory_space<any>>) target(%10 : memref<1x256xf32, #tpu.memory_space<any>>) target_semaphore(%12 : memref<!tpu.dma_semaphore, #tpu.memory_space<semaphore_mem>>)
    %c2_i32 = arith.constant 2 : i32
    %13 = arith.addi %0, %c2_i32 : i32
    %c2_i32_8 = arith.constant 2 : i32
    %14 = arith.addi %0, %c2_i32_8 : i32
    %c2_i32_9 = arith.constant 2 : i32
    %c0_i32_10 = arith.constant 0 : i32
    %15 = tpu.memref_slice %arg1[%13, %c0_i32_10] : memref<8x256xf32, #tpu.memory_space<any>> -> memref<1x256xf32, #tpu.memory_space<any>>
    %c0_i32_11 = arith.constant 0 : i32
    %16 = tpu.memref_slice %arg2[%14, %c0_i32_11] : memref<8x256xf32, #tpu.memory_space<any>> -> memref<1x256xf32, #tpu.memory_space<any>>
    %17 = tpu.memref_slice %arg3[%c2_i32_9] : memref<4x!tpu.dma_semaphore, #tpu.memory_space<semaphore_mem>> -> memref<1x!tpu.dma_semaphore, #tpu.memory_space<semaphore_mem>>
    %18 = tpu.memref_squeeze %17 : memref<1x!tpu.dma_semaphore, #tpu.memory_space<semaphore_mem>> -> memref<!tpu.dma_semaphore, #tpu.memory_space<semaphore_mem>>
    tpu.enqueue_dma source(%15 : memref<1x256xf32, #tpu.memory_space<any>>) target(%16 : memref<1x256xf32, #tpu.memory_space<any>>) target_semaphore(%18 : memref<!tpu.dma_semaphore, #tpu.memory_space<semaphore_mem>>)
    %c3_i32 = arith.constant 3 : i32
    %19 = arith.addi %0, %c3_i32 : i32
    %c3_i32_12 = arith.constant 3 : i32
    %20 = arith.addi %0, %c3_i32_12 : i32
    %c3_i32_13 = arith.constant 3 : i32
    %c0_i32_14 = arith.constant 0 : i32
    %21 = tpu.memref_slice %arg1[%19, %c0_i32_14] : memref<8x256xf32, #tpu.memory_space<any>> -> memref<1x256xf32, #tpu.memory_space<any>>
    %c0_i32_15 = arith.constant 0 : i32
    %22 = tpu.memref_slice %arg2[%20, %c0_i32_15] : memref<8x256xf32, #tpu.memory_space<any>> -> memref<1x256xf32, #tpu.memory_space<any>>
    %23 = tpu.memref_slice %arg3[%c3_i32_13] : memref<4x!tpu.dma_semaphore, #tpu.memory_space<semaphore_mem>> -> memref<1x!tpu.dma_semaphore, #tpu.memory_space<semaphore_mem>>
    %24 = tpu.memref_squeeze %23 : memref<1x!tpu.dma_semaphore, #tpu.memory_space<semaphore_mem>> -> memref<!tpu.dma_semaphore, #tpu.memory_space<semaphore_mem>>
    tpu.enqueue_dma source(%21 : memref<1x256xf32, #tpu.memory_space<any>>) target(%22 : memref<1x256xf32, #tpu.memory_space<any>>) target_semaphore(%24 : memref<!tpu.dma_semaphore, #tpu.memory_space<semaphore_mem>>)
    %c0_i32_16 = arith.constant 0 : i32
    %c0_i32_17 = arith.constant 0 : i32
    %25 = tpu.memref_slice %arg1[%1, %c0_i32_17] : memref<8x256xf32, #tpu.memory_space<any>> -> memref<1x256xf32, #tpu.memory_space<any>>
    %c0_i32_18 = arith.constant 0 : i32
    %26 = tpu.memref_slice %arg2[%2, %c0_i32_18] : memref<8x256xf32, #tpu.memory_space<any>> -> memref<1x256xf32, #tpu.memory_space<any>>
    %27 = tpu.memref_slice %arg3[%c0_i32_16] : memref<4x!tpu.dma_semaphore, #tpu.memory_space<semaphore_mem>> -> memref<1x!tpu.dma_semaphore, #tpu.memory_space<semaphore_mem>>
    %28 = tpu.memref_squeeze %27 : memref<1x!tpu.dma_semaphore, #tpu.memory_space<semaphore_mem>> -> memref<!tpu.dma_semaphore, #tpu.memory_space<semaphore_mem>>
    tpu.wait_dma2 semaphore(%28 : memref<!tpu.dma_semaphore, #tpu.memory_space<semaphore_mem>>) src(%25 : memref<1x256xf32, #tpu.memory_space<any>>) dst(%26 : memref<1x256xf32, #tpu.memory_space<any>>)
    %c1_i32_19 = arith.constant 1 : i32
    %c0_i32_20 = arith.constant 0 : i32
    %29 = tpu.memref_slice %arg1[%7, %c0_i32_20] : memref<8x256xf32, #tpu.memory_space<any>> -> memref<1x256xf32, #tpu.memory_space<any>>
    %c0_i32_21 = arith.constant 0 : i32
    %30 = tpu.memref_slice %arg2[%8, %c0_i32_21] : memref<8x256xf32, #tpu.memory_space<any>> -> memref<1x256xf32, #tpu.memory_space<any>>
    %31 = tpu.memref_slice %arg3[%c1_i32_19] : memref<4x!tpu.dma_semaphore, #tpu.memory_space<semaphore_mem>> -> memref<1x!tpu.dma_semaphore, #tpu.memory_space<semaphore_mem>>
    %32 = tpu.memref_squeeze %31 : memref<1x!tpu.dma_semaphore, #tpu.memory_space<semaphore_mem>> -> memref<!tpu.dma_semaphore, #tpu.memory_space<semaphore_mem>>
    tpu.wait_dma2 semaphore(%32 : memref<!tpu.dma_semaphore, #tpu.memory_space<semaphore_mem>>) src(%29 : memref<1x256xf32, #tpu.memory_space<any>>) dst(%30 : memref<1x256xf32, #tpu.memory_space<any>>)
    %c2_i32_22 = arith.constant 2 : i32
    %c0_i32_23 = arith.constant 0 : i32
    %33 = tpu.memref_slice %arg1[%13, %c0_i32_23] : memref<8x256xf32, #tpu.memory_space<any>> -> memref<1x256xf32, #tpu.memory_space<any>>
    %c0_i32_24 = arith.constant 0 : i32
    %34 = tpu.memref_slice %arg2[%14, %c0_i32_24] : memref<8x256xf32, #tpu.memory_space<any>> -> memref<1x256xf32, #tpu.memory_space<any>>
    %35 = tpu.memref_slice %arg3[%c2_i32_22] : memref<4x!tpu.dma_semaphore, #tpu.memory_space<semaphore_mem>> -> memref<1x!tpu.dma_semaphore, #tpu.memory_space<semaphore_mem>>
    %36 = tpu.memref_squeeze %35 : memref<1x!tpu.dma_semaphore, #tpu.memory_space<semaphore_mem>> -> memref<!tpu.dma_semaphore, #tpu.memory_space<semaphore_mem>>
    tpu.wait_dma2 semaphore(%36 : memref<!tpu.dma_semaphore, #tpu.memory_space<semaphore_mem>>) src(%33 : memref<1x256xf32, #tpu.memory_space<any>>) dst(%34 : memref<1x256xf32, #tpu.memory_space<any>>)
    %c3_i32_25 = arith.constant 3 : i32
    %c0_i32_26 = arith.constant 0 : i32
    %37 = tpu.memref_slice %arg1[%19, %c0_i32_26] : memref<8x256xf32, #tpu.memory_space<any>> -> memref<1x256xf32, #tpu.memory_space<any>>
    %c0_i32_27 = arith.constant 0 : i32
    %38 = tpu.memref_slice %arg2[%20, %c0_i32_27] : memref<8x256xf32, #tpu.memory_space<any>> -> memref<1x256xf32, #tpu.memory_space<any>>
    %39 = tpu.memref_slice %arg3[%c3_i32_25] : memref<4x!tpu.dma_semaphore, #tpu.memory_space<semaphore_mem>> -> memref<1x!tpu.dma_semaphore, #tpu.memory_space<semaphore_mem>>
    %40 = tpu.memref_squeeze %39 : memref<1x!tpu.dma_semaphore, #tpu.memory_space<semaphore_mem>> -> memref<!tpu.dma_semaphore, #tpu.memory_space<semaphore_mem>>
    tpu.wait_dma2 semaphore(%40 : memref<!tpu.dma_semaphore, #tpu.memory_space<semaphore_mem>>) src(%37 : memref<1x256xf32, #tpu.memory_space<any>>) dst(%38 : memref<1x256xf32, #tpu.memory_space<any>>)
    return
  }
}

</mosaic_0001>

<bundles_post_ra>
// kernel: tpu_custom_call.1
= control target key start
LH: loop header
LB: loop body
LE: loop exit
PB: predicated region body
PF: predicated region fallthrough
CT: control target
= control target key end

     0   :  { %s246_s6 = smov 0   ;;  %s302_s0 = inlined_call_operand.hbm [shape: f32[8,256], index: 0, kind: input, shape index: {}]   ;;  %s303_s1 = inlined_call_operand.hbm [shape: f32[8,256], index: 1, kind: output, shape index: {}]  }
   0x1 LB: > { %s252_s7 = sshll.u32 %s223_s6, 2  ;;  %s225_s11 = smov 128   ;;  %s223_s6 = sphi %s246_s6, %s11_s6  }
   0x2   : > { %s14_s8 = sshrl.u32 %s252_s7, 3  ;;  %s15_s9 = sand.u32 7, %s252_s7  }
   0x3   : > { %s182_s10 = sshll.u32 %s14_s8, 4  ;;  %31 = sst [smem:[#allocation4]] %s225_s11 }
   0x4   : > { %s17_s12 = sadd.s32 %s182_s10, %s15_s9  ;;  %33 = sst [smem:[#allocation4 + $0x1]] %s225_s11 }
   0x5   : > { %s18_s15 = scalar_lea.hbm %s302_s0, %s17_s12  ;;  %s19_s18 = scalar_lea.hbm %s303_s1, %s17_s12 }
   0x6   : > { %s24_s19 = sshll.u32 %s18_s15, 4  ;;  %s26_s20 = sshll.u32 %s19_s18, 4  ;;  %s25_s19 = int_to_ptr.hbm [resolvable:$true] %s24_s19  ;;  %s27_s20 = int_to_ptr.hbm [resolvable:$true] %s26_s20 }
   0x7   : > { %s226_s21 = smov 1   ;;  %s38_s22 = sadd.s32 1, %s252_s7 }
   0x8   : > { %35 = sst [smem:[#allocation4 + $0x2]] %s226_s21  ;;  %s227_s23 = smov [#allocation2]  }
   0x9   : > { %s228_s24 = smov [#allocation3]   ;;  %s229_s25 = smov 0  }
   0xa   : > { %37 = dma.general %s25_s19, 32, %s27_s20, %s227_s23, %s228_s24, [#allocation4], %s229_s25, 0  }
   0xb   : > { %57 = sst [smem:[#allocation6]] %s225_s11  ;;  %s39_s26 = sshrl.u32 %s38_s22, 3 }
   0xc   : > { %59 = sst [smem:[#allocation6 + $0x1]] %s225_s11  ;;  %s40_s27 = sand.u32 7, %s38_s22  }
   0xd   : > { %61 = sst [smem:[#allocation6 + $0x2]] %s226_s21  ;;  %s183_s28 = sshll.u32 %s39_s26, 4 }
   0xe   : > { %s42_s29 = sadd.s32 %s183_s28, %s40_s27  ;;  %s64_s12 = sadd.s32 2, %s252_s7 }
   0xf   : > { %s43_s3 = scalar_lea.hbm %s302_s0, %s42_s29  ;;  %s44_s8 = scalar_lea.hbm %s303_s1, %s42_s29 }
  0x10   : > { %s50_s9 = sshll.u32 %s43_s3, 4  ;;  %s52_s10 = sshll.u32 %s44_s8, 4  ;;  %s51_s9 = int_to_ptr.hbm [resolvable:$true] %s50_s9  ;;  %s53_s10 = int_to_ptr.hbm [resolvable:$true] %s52_s10 }
  0x11   : > { %s230_s13 = smov [#allocation2 + $0x1]   ;;  %s231_s14 = smov [#allocation5]  }
  0x12   : > { %63 = dma.general %s51_s9, 32, %s53_s10, %s230_s13, %s231_s14, [#allocation6], %s229_s25, 0  }
  0x13   : > { %83 = sst [smem:[#allocation8]] %s225_s11  ;;  %s65_s15 = sshrl.u32 %s64_s12, 3 }
  0x14   : > { %85 = sst [smem:[#allocation8 + $0x1]] %s225_s11  ;;  %s66_s16 = sand.u32 7, %s64_s12  }
  0x15   : > { %87 = sst [smem:[#allocation8 + $0x2]] %s226_s21  ;;  %s184_s17 = sshll.u32 %s65_s15, 4 }
  0x16   : > { %s68_s18 = sadd.s32 %s184_s17, %s66_s16  ;;  %s90_s29 = sadd.s32 3, %s252_s7 }
  0x17   : > { %s69_s22 = scalar_lea.hbm %s302_s0, %s68_s18  ;;  %s70_s26 = scalar_lea.hbm %s303_s1, %s68_s18 }
  0x18   : > { %s76_s27 = sshll.u32 %s69_s22, 4  ;;  %s78_s28 = sshll.u32 %s70_s26, 4  ;;  %s77_s27 = int_to_ptr.hbm [resolvable:$true] %s76_s27  ;;  %s79_s28 = int_to_ptr.hbm [resolvable:$true] %s78_s28 }
  0x19   : > { %s232_s30 = smov [#allocation2 + $0x2]   ;;  %s233_s2 = smov [#allocation7]  }
  0x1a   : > { %89 = dma.general %s77_s27, 32, %s79_s28, %s232_s30, %s233_s2, [#allocation8], %s229_s25, 0  }
  0x1b   : > { %109 = sst [smem:[#allocation10]] %s225_s11  ;;  %s91_s3 = sshrl.u32 %s90_s29, 3 }
  0x1c   : > { %111 = sst [smem:[#allocation10 + $0x1]] %s225_s11  ;;  %s92_s4 = sand.u32 7, %s90_s29  }
  0x1d   : > { %113 = sst [smem:[#allocation10 + $0x2]] %s226_s21  ;;  %s185_s5 = sshll.u32 %s91_s3, 4 }
  0x1e   : > { %s94_s8 = sadd.s32 %s185_s5, %s92_s4  ;;  %s234_s17 = smov [#allocation2 + $0x3]  }
  0x1f   : > { %s95_s12 = scalar_lea.hbm %s302_s0, %s94_s8  ;;  %s96_s14 = scalar_lea.hbm %s303_s1, %s94_s8 }
  0x20   : > { %s102_s15 = sshll.u32 %s95_s12, 4  ;;  %s104_s16 = sshll.u32 %s96_s14, 4  ;;  %s103_s15 = int_to_ptr.hbm [resolvable:$true] %s102_s15  ;;  %s105_s16 = int_to_ptr.hbm [resolvable:$true] %s104_s16 }
  0x21   : > { %s235_s18 = smov [#allocation9]  }
  0x22   : > { %115 = dma.general %s103_s15, 32, %s105_s16, %s234_s17, %s235_s18, [#allocation10], %s229_s25, 0  }
  0x23   : > { %213 = dma.done.wait [#allocation2], 32 }
  0x24   : > { %214 = vsyncadd [#allocation2], 4294967264 }
  0x25   : > { %215 = dma.done.wait [#allocation2 + $0x1], 32 }
  0x26   : > { %216 = vsyncadd [#allocation2 + $0x1], 4294967264 }
  0x27   : > { %217 = dma.done.wait [#allocation2 + $0x2], 32 }
  0x28   : > { %218 = vsyncadd [#allocation2 + $0x2], 4294967264 }
  0x29   : > { %219 = dma.done.wait [#allocation2 + $0x3], 32 }
  0x2a   : > { %220 = vsyncadd [#allocation2 + $0x3], 4294967264  ;;  %s11_s6 = sadd.s32 1, %s223_s6  }
  0x2b   : > { %p8_p0 = scmp.ge.s32.totalorder %s11_s6, 2  }
  0x2d   :  { %10 = sbr.rel (!%p8_p0) target bundleno = 1 (0x1), region = 41 }
  0x32   :  { %125 = vsyncmov [#allocation2] }
  0x35   :  { %s126_s11 = vpop.sfrf %125 }
  0x36   :  { %p186_p1 = scmp.ne.s32.totalorder %s126_s11, 0 }
  0x38   :  { %130 = shalt.err (%p186_p1)  }
  0x39   :  { %132 = vsyncmov [#allocation2 + $0x1] }
  0x3c   :  { %s133_s21 = vpop.sfrf %132 }
  0x3d   :  { %p187_p2 = scmp.ne.s32.totalorder %s133_s21, 0 }
  0x3f   :  { %137 = shalt.err (%p187_p2)  }
  0x40   :  { %139 = vsyncmov [#allocation2 + $0x2] }
  0x43   :  { %s140_s25 = vpop.sfrf %139 }
  0x44   :  { %p188_p3 = scmp.ne.s32.totalorder %s140_s25, 0 }
  0x46   :  { %144 = shalt.err (%p188_p3)  }
  0x47   :  { %146 = vsyncmov [#allocation2 + $0x3] }
  0x4a   :  { %s147_s19 = vpop.sfrf %146 }
  0x4b   :  { %p189_p4 = scmp.ne.s32.totalorder %s147_s19, 0 }
  0x4d   :  { %151 = shalt.err (%p189_p4)  }

</bundles_post_ra>
